<compile_context>
chip_gen: v7x
topology: tpu7x:2x2x1
jax: 0.10.0
libtpu: 0.0.40
codegen_flags: <defaults>
</compile_context>

<pallas_src>
import functools

import jax
import jax.numpy as jnp
from jax import lax
from jax.experimental import pallas as pl
from jax.experimental.pallas import tpu as pltpu

_LANE = 128   # tiles kept multiples of 128: covers sublane minimums (8/16/32)
              # for f32/bf16/int8 and the lane-dim BlockSpec constraint.


def _round_up(x: int, m: int) -> int:
    return ((x + m - 1) // m) * m


def _vmem_capacity_bytes() -> int:
    """Per-core VMEM (128 MiB v5e/v6e, 64 MiB v7x); conservative fallback."""
    try:
        cap = int(getattr(pltpu.get_tpu_info(), "vmem_capacity_bytes", 0))
        if cap > 0:
            return cap
    except Exception:
        pass
    return 64 << 20


# ---------------------------------------------------------------------------
# Wide path: tiled upper-triangular Gram sweep over row-slab pairs.
# ---------------------------------------------------------------------------
def _pair_kernel(bi_ref, bj_ref, wt_ref, wi_ref, wj_ref, invi_ref, invj_ref,
                 out_ref, *, n_rows: int, tm: int, steps_per_core: int):
    c = pl.program_id(0)                 # core slice of the pair schedule
    t = pl.program_id(1)                 # step within the slice
    idx = c * steps_per_core + t

    @pl.when(t == 0)
    def _init():
        out_ref[...] = jnp.zeros_like(out_ref)

    wt = wt_ref[idx]                     # 1 = diag block, 2 = off-diag, 0 = padding

    @pl.when(wt > 0)
    def _compute():
        bi = bi_ref[idx]
        bj = bj_ref[idx]
        diag_f = (bi == bj).astype(jnp.float32)

        # Raw Gram block on the MXU (native-dtype operands, f32 accumulation);
        # normalization applied afterwards as rank-1 row / column scales.
        # TODO(synk): optional wrapper-level f32->bf16 cast of W for 2x HBM and
        # native-rate MXU (needs tolerance re-validation vs the f32 reference).
        g = lax.dot_general(wi_ref[...], wj_ref[...], (((1,), (1,)), ((), ())),
                            preferred_element_type=jnp.float32)        # (tm, tm)
        g = g * invi_ref[...]            # (tm, 1) row scale
        g = g * invj_ref[...]            # (1, tm) column scale

        # Subtract identity on the valid diagonal BEFORE squaring.
        rows = lax.broadcasted_iota(jnp.int32, (tm, tm), 0)
        cols = lax.broadcasted_iota(jnp.int32, (tm, tm), 1)
        eye = jnp.where((rows == cols) & (rows + bi * tm < n_rows), 1.0, 0.0)
        gm = g - diag_f * eye

        out_ref[...] += wt.astype(jnp.float32) * jnp.sum(gm * gm)


def _pair_reg(weights, vmem_cap, block_rows):
    n, d = weights.shape
    itemsize = weights.dtype.itemsize

    # Largest lane-aligned row tile whose working set (single-buffered wi slab,
    # double-buffered wj slab, f32 Gram temporaries) fits ~70% of VMEM.
    cap = 1024 if block_rows is None else max(_LANE, _round_up(block_rows, _LANE))
    cap = min(cap, _round_up(n, _LANE))
    budget = int(vmem_cap * 0.70)
    tm = cap
    while tm > _LANE and (3 * tm * d * itemsize + 4 * tm * tm * 4 + (2 << 20)) > budget:
        tm -= _LANE
    n_pad = _round_up(n, tm)
    nb = n_pad // tm
    w = weights if n_pad == n else jnp.pad(weights, ((0, n_pad - n), (0, 0)))

    # Inverse row L2 norms, computed once (padded rows -> 0): fed as a (tm, 1)
    # row scale (bi-indexed) and a lane-major (1, tm) column scale (bj-indexed).
    sq = jnp.sum(jnp.square(weights.astype(jnp.float32)), axis=-1)
    inv = (1.0 / (1e-10 + jnp.sqrt(sq))).astype(jnp.float32)
    inv = jnp.pad(inv, (0, n_pad - n))
    inv_row = inv.reshape(n_pad, 1)
    inv_col = inv.reshape(1, n_pad)

    # i-major upper-triangular block-pair schedule, split into two balanced
    # contiguous halves (leading "parallel" axis -> both v7x TensorCores).
    pairs = [(i, j) for i in range(nb) for j in range(i, nb)]
    n_pairs = len(pairs)
    ncores = 2
    half = (n_pairs + ncores - 1) // ncores
    bi_l, bj_l, wt_l = [], [], []
    for s in range(ncores * half):
        if s < n_pairs:
            i, j = pairs[s]
            bi_l.append(i); bj_l.append(j); wt_l.append(1 if i == j else 2)
        else:                                          # balance padding, skipped
            bi_l.append(0); bj_l.append(0); wt_l.append(0)
    bi_tab = jnp.asarray(bi_l, jnp.int32)
    bj_tab = jnp.asarray(bj_l, jnp.int32)
    wt_tab = jnp.asarray(wt_l, jnp.int32)

    kernel = functools.partial(_pair_kernel, n_rows=n, tm=tm, steps_per_core=half)

    grid_spec = pltpu.PrefetchScalarGridSpec(
        num_scalar_prefetch=3,
        grid=(ncores, half),
        in_specs=[
            # Row slab: its block index changes only nb times per sweep ->
            # single-buffer it and spend the freed VMEM on a larger tile.
            pl.BlockSpec((tm, d), lambda c, t, bi, bj, wt: (bi[c * half + t], 0),
                         pipeline_mode=pl.Buffered(1)),
            pl.BlockSpec((tm, d), lambda c, t, bi, bj, wt: (bj[c * half + t], 0)),
            pl.BlockSpec((tm, 1), lambda c, t, bi, bj, wt: (bi[c * half + t], 0)),
            pl.BlockSpec((1, tm), lambda c, t, bi, bj, wt: (0, bj[c * half + t])),
        ],
        # Per-core resident accumulator tile (lane-dense (8, 128)); partial sums
        # are reduced and koef * |x - 0.1| applied in the wrapper.
        out_specs=pl.BlockSpec((8, _LANE), lambda c, t, bi, bj, wt: (c, 0)),
    )

    need = 3 * tm * d * itemsize + 4 * tm * tm * 4 + (2 << 20)
    vmem_limit = int(max(32 << 20, min(int(vmem_cap * 0.85), need + (8 << 20))))
    cost = pl.CostEstimate(
        flops=int(2.0 * n_pairs * tm * tm * d),
        transcendentals=0,
        bytes_accessed=int((n_pairs + nb) * tm * d * itemsize + 2 * n_pad * 4),
    )

    out = pl.pallas_call(
        kernel,
        out_shape=jax.ShapeDtypeStruct((ncores * 8, _LANE), jnp.float32),
        grid_spec=grid_spec,
        compiler_params=pltpu.CompilerParams(
            dimension_semantics=("parallel", "arbitrary"),
            vmem_limit_bytes=vmem_limit,
        ),
        cost_estimate=cost,
    )(bi_tab, bj_tab, wt_tab, w, w, inv_row, inv_col)
    return jnp.sum(out[::8, 0])          # one partial per core


# ---------------------------------------------------------------------------
# Tall path (D < N): accumulate C = Wn^T Wn (D x D) in VMEM, one pass over rows.
# ---------------------------------------------------------------------------
def _gram_d_kernel(w_ref, out_ref, c_ref, tr_ref, *, n_rows: int):
    t = pl.program_id(0)

    @pl.when(t == 0)
    def _init():
        c_ref[...] = jnp.zeros_like(c_ref)
        tr_ref[...] = jnp.zeros_like(tr_ref)

    w = w_ref[...].astype(jnp.float32)                               # (rows, D)
    sq = jnp.sum(w * w, axis=-1, keepdims=True)                      # (rows, 1)
    inv = pl.reciprocal(1e-10 + jnp.sqrt(sq), approx=False)
    wn = w * inv                                                     # normalized rows
    # TODO(synk): optional bf16 cast of wn for native-rate MXU (re-check tolerance).
    c_ref[...] += lax.dot_general(wn, wn, (((0,), (0,)), ((), ())),
                                  preferred_element_type=jnp.float32)    # (D, D)
    tr_ref[...] += jnp.sum(sq * inv * inv, keepdims=True)            # slab part of tr(G)

    @pl.when(t == pl.num_programs(0) - 1)
    def _finalize():
        cmat = c_ref[...]
        # sum((G - I)^2) = ||C||_F^2 - 2 tr(G) + N,   C = Wn^T Wn
        out_ref[...] = (jnp.sum(cmat * cmat, keepdims=True)
                        - 2.0 * tr_ref[...] + jnp.float32(n_rows))


def _gram_d_reg(weights, vmem_cap, block_rows):
    n, d = weights.shape
    itemsize = weights.dtype.itemsize

    budget = int(vmem_cap * 0.70) - d * d * 4
    cap = 1024 if block_rows is None else max(_LANE, _round_up(block_rows, _LANE))
    cap = min(cap, _round_up(n, _LANE))
    rows = cap
    while rows > _LANE and (2 * rows * d * (itemsize + 4) + (2 << 20)) > budget:
        rows -= _LANE
    n_pad = _round_up(n, rows)
    nb = n_pad // rows
    w = weights if n_pad == n else jnp.pad(weights, ((0, n_pad - n), (0, 0)))

    kernel = functools.partial(_gram_d_kernel, n_rows=n)

    need = 2 * rows * d * (itemsize + 4) + d * d * 4 + (2 << 20)
    vmem_limit = int(max(32 << 20, min(int(vmem_cap * 0.85), need + (8 << 20))))
    cost = pl.CostEstimate(flops=int(2.0 * n_pad * d * d),
                           transcendentals=int(n_pad),
                           bytes_accessed=int(n_pad * d * itemsize))

    out = pl.pallas_call(
        kernel,
        out_shape=jax.ShapeDtypeStruct((1, 1), jnp.float32),
        grid_spec=pltpu.PrefetchScalarGridSpec(
            num_scalar_prefetch=0,
            grid=(nb,),
            in_specs=[pl.BlockSpec((rows, d), lambda t: (t, 0))],
            out_specs=pl.BlockSpec((1, 1), lambda t: (0, 0)),
            scratch_shapes=[pltpu.VMEM((d, d), jnp.float32),
                            pltpu.VMEM((1, 1), jnp.float32)],
        ),
        compiler_params=pltpu.CompilerParams(
            # TODO(synk): v7x two-core split (two partial C accumulators) if this
            # FLOP/HBM-minimal path ever dominates end-to-end time.
            dimension_semantics=("arbitrary",),
            vmem_limit_bytes=vmem_limit,
        ),
        cost_estimate=cost,
    )(w)
    return out[0, 0]


# ---------------------------------------------------------------------------
# Public wrapper (== OrtogonalLoss.forward)
# ---------------------------------------------------------------------------
def ortho_loss(weights: jax.Array, koef: float, *, block_rows=None) -> jax.Array:
    """Pallas TPU implementation of OrtogonalLoss.forward(weights)."""
    assert weights.ndim == 2, "ortho_reg expects a 2-D weight matrix"
    n, d = weights.shape
    vmem_cap = _vmem_capacity_bytes()
    if d < n and d * d * 4 <= int(vmem_cap * 0.35):
        reg = _gram_d_reg(weights, vmem_cap, block_rows)
    else:
        reg = _pair_reg(weights, vmem_cap, block_rows)
    return jnp.float32(koef) * jnp.abs(reg - jnp.float32(0.1))


def _reference(weights: jax.Array, koef: float) -> jax.Array:
    w = weights.astype(jnp.float32)
    wn = w / (1e-10 + jnp.sqrt(jnp.sum(w * w, axis=-1, keepdims=True)))
    n = wn.shape[0]
    reg = jnp.sum((wn @ wn.T - jnp.eye(n, dtype=jnp.float32)) ** 2)
    return koef * jnp.abs(reg - 0.1)


if __name__ == "__main__":
    key = jax.random.PRNGKey(0)
    k1, k2, k3 = jax.random.split(key, 3)
    koef = 0.5

    # Test 1: wide matrix (D >= N) -> single Gram block, one real pair step.
    w1 = jax.random.normal(k1, (32, 128), dtype=jnp.float32)
    l1 = jax.block_until_ready(ortho_loss(w1, koef))
    r1 = jax.block_until_ready(_reference(w1, koef))

    # Test 2: wide matrix, forced 128-row tiles -> 3x3 upper-triangular block
    # sweep across both schedule halves, with row padding (320 -> 384).
    w2 = jax.random.normal(k2, (320, 128), dtype=jnp.float32)
    l2 = jax.block_until_ready(ortho_loss(w2, koef, block_rows=128))
    r2 = jax.block_until_ready(_reference(w2, koef))

    # Test 3: tall matrix (D < N) -> Wn^T Wn reformulation path, 2 row slabs.
    w3 = jax.random.normal(k3, (256, 64), dtype=jnp.float32)
    l3 = jax.block_until_ready(ortho_loss(w3, koef, block_rows=128))
    r3 = jax.block_until_ready(_reference(w3, koef))

    # The tiled kernels re-associate the f32 reductions, so bit-exact agreement
    # with the direct (G - I)^2 reference is not expected.
    assert jnp.allclose(l1, r1, rtol=5e-4, atol=1e-4), (l1, r1)
    assert jnp.allclose(l2, r2, rtol=5e-4, atol=1e-4), (l2, r2)
    assert jnp.allclose(l3, r3, rtol=5e-4, atol=1e-4), (l3, r3)
    print("KERNEL_OK")
</pallas_src>

<mosaic_0001>
module attributes {stable_mosaic.version = 11 : i64} {
  func.func @_pair_kernel(%arg0: i32, %arg1: i32, %arg2: memref<2xi32, #tpu.memory_space<smem>>, %arg3: memref<2xi32, #tpu.memory_space<smem>>, %arg4: memref<2xi32, #tpu.memory_space<smem>>, %arg5: memref<128x128xf32, #tpu.memory_space<vmem>>, %arg6: memref<128x128xf32, #tpu.memory_space<vmem>>, %arg7: memref<128x1xf32, #tpu.memory_space<vmem>>, %arg8: memref<1x128xf32, #tpu.memory_space<vmem>>, %arg9: memref<8x128xf32, #tpu.memory_space<vmem>>) attributes {dimension_semantics = [#tpu.dimension_semantics<parallel>, #tpu.dimension_semantics<arbitrary>], iteration_bounds = array<i64: 2, 1>, scalar_prefetch = 3 : i64, scratch_operands = 0 : i64, tpu.core_type = #tpu.core_type<tc>, window_params = [{pipeline_mode = #tpu.pipeline_mode<synchronous>, transform_indices = @transform_0, window_bounds = array<i64: 128, 128>}, {transform_indices = @transform_1, window_bounds = array<i64: 128, 128>}, {transform_indices = @transform_2, window_bounds = array<i64: 128, 1>}, {transform_indices = @transform_3, window_bounds = array<i64: 1, 128>}, {transform_indices = @transform_4, window_bounds = array<i64: 8, 128>}]} {
    %c1_i32 = arith.constant 1 : i32
    %0 = arith.muli %arg0, %c1_i32 : i32
    %1 = arith.addi %0, %arg1 : i32
    %c0_i32 = arith.constant 0 : i32
    %2 = arith.cmpi eq, %arg1, %c0_i32 : i32
    %3 = arith.extui %2 : i1 to i32
    %c0_i32_0 = arith.constant 0 : i32
    %4 = arith.cmpi ne, %3, %c0_i32_0 : i32
    scf.if %4 {
      %cst = arith.constant 0.000000e+00 : f32
      %10 = vector.broadcast %cst : f32 to vector<8x128xf32>
      %c0 = arith.constant 0 : index
      %c0_3 = arith.constant 0 : index
      %11 = vector.load %arg9[%c0, %c0_3] : memref<8x128xf32, #tpu.memory_space<vmem>>, vector<8x128xf32>
      tpu.vector_store %arg9[%c0, %c0_3], %10 {strides = array<i32>} : memref<8x128xf32, #tpu.memory_space<vmem>>, vector<8x128xf32>,
    } else {
    }
    %5 = arith.index_cast %1 : i32 to index
    %6 = memref.load %arg4[%5] : memref<2xi32, #tpu.memory_space<smem>>
    %c0_i32_1 = arith.constant 0 : i32
    %7 = arith.cmpi sgt, %6, %c0_i32_1 : i32
    %8 = arith.extui %7 : i1 to i32
    %c0_i32_2 = arith.constant 0 : i32
    %9 = arith.cmpi ne, %8, %c0_i32_2 : i32
    scf.if %9 {
      %10 = arith.index_cast %1 : i32 to index
      %11 = memref.load %arg2[%10] : memref<2xi32, #tpu.memory_space<smem>>
      %12 = arith.index_cast %1 : i32 to index
      %13 = memref.load %arg3[%12] : memref<2xi32, #tpu.memory_space<smem>>
      %14 = arith.cmpi eq, %11, %13 : i32
      %15 = arith.extui %14 : i1 to i32
      %16 = arith.sitofp %15 : i32 to f32
      %c0 = arith.constant 0 : index
      %c0_3 = arith.constant 0 : index
      %17 = vector.load %arg5[%c0, %c0_3] : memref<128x128xf32, #tpu.memory_space<vmem>>, vector<128x128xf32>
      %c0_4 = arith.constant 0 : index
      %c0_5 = arith.constant 0 : index
      %18 = vector.load %arg6[%c0_4, %c0_5] : memref<128x128xf32, #tpu.memory_space<vmem>>, vector<128x128xf32>
      %cst = arith.constant dense<0.000000e+00> : vector<128x128xf32>
      %19 = tpu.matmul %17, %18, %cst {dimension_numbers = #tpu.dot_dimension_numbers<[1], [1], [0], [0], [0, 0, 1, 0], [], []>} : vector<128x128xf32>, vector<128x128xf32>, vector<128x128xf32> -> vector<128x128xf32>
      %c0_6 = arith.constant 0 : index
      %c0_7 = arith.constant 0 : index
      %20 = vector.load %arg7[%c0_6, %c0_7] : memref<128x1xf32, #tpu.memory_space<vmem>>, vector<128x1xf32>
      %21 = vector.broadcast %20 : vector<128x1xf32> to vector<128x128xf32>
      %22 = arith.mulf %19, %21 : vector<128x128xf32>
      %c0_8 = arith.constant 0 : index
      %c0_9 = arith.constant 0 : index
      %23 = vector.load %arg8[%c0_8, %c0_9] : memref<1x128xf32, #tpu.memory_space<vmem>>, vector<1x128xf32>
      %24 = vector.broadcast %23 : vector<1x128xf32> to vector<128x128xf32>
      %25 = arith.mulf %22, %24 : vector<128x128xf32>
      %26 = tpu.iota {dimensions = array<i32: 0>} : vector<128x128xi32>
      %27 = tpu.iota {dimensions = array<i32: 1>} : vector<128x128xi32>
      %28 = arith.cmpi eq, %26, %27 : vector<128x128xi32>
      %c128_i32 = arith.constant 128 : i32
      %29 = arith.muli %11, %c128_i32 : i32
      %30 = vector.broadcast %29 : i32 to vector<128x128xi32>
      %31 = arith.addi %26, %30 : vector<128x128xi32>
      %c32_i32 = arith.constant 32 : i32
      %32 = vector.broadcast %c32_i32 : i32 to vector<128x128xi32>
      %33 = arith.cmpi slt, %31, %32 : vector<128x128xi32>
      %34 = arith.andi %28, %33 : vector<128x128xi1>
      %cst_10 = arith.constant 1.000000e+00 : f32
      %cst_11 = arith.constant 0.000000e+00 : f32
      %35 = vector.broadcast %cst_10 : f32 to vector<128x128xf32>
      %36 = vector.broadcast %cst_11 : f32 to vector<128x128xf32>
      %37 = arith.select %34, %35, %36 : vector<128x128xi1>, vector<128x128xf32>
      %38 = vector.broadcast %16 : f32 to vector<128x128xf32>
      %39 = arith.mulf %38, %37 : vector<128x128xf32>
      %40 = arith.subf %25, %39 : vector<128x128xf32>
      %c0_12 = arith.constant 0 : index
      %c0_13 = arith.constant 0 : index
      %41 = vector.load %arg9[%c0_12, %c0_13] : memref<8x128xf32, #tpu.memory_space<vmem>>, vector<8x128xf32>
      %42 = arith.sitofp %6 : i32 to f32
      %43 = arith.mulf %40, %40 : vector<128x128xf32>
      %44 = vector.shape_cast %43 : vector<128x128xf32> to vector<1x128x128xf32>
      %cst_14 = arith.constant dense<0.000000e+00> : vector<1xf32>
      %45 = vector.multi_reduction <add>, %44, %cst_14 [1, 2] : vector<1x128x128xf32> to vector<1xf32>
      %46 = vector.shape_cast %45 : vector<1xf32> to vector<1x1x1xf32>
      %47 = vector.extract %46[0, 0, 0] : f32 from vector<1x1x1xf32>
      %48 = arith.mulf %42, %47 : f32
      %49 = vector.broadcast %48 : f32 to vector<8x128xf32>
      %50 = arith.addf %41, %49 : vector<8x128xf32>
      %c0_15 = arith.constant 0 : index
      %c0_16 = arith.constant 0 : index
      %51 = vector.load %arg9[%c0_15, %c0_16] : memref<8x128xf32, #tpu.memory_space<vmem>>, vector<8x128xf32>
      tpu.vector_store %arg9[%c0_15, %c0_16], %50 {strides = array<i32>} : memref<8x128xf32, #tpu.memory_space<vmem>>, vector<8x128xf32>,
    } else {
    }
    return
  }
  func.func @transform_0(%arg0: i32, %arg1: i32, %arg2: memref<2xi32, #tpu.memory_space<smem>>, %arg3: memref<2xi32, #tpu.memory_space<smem>>, %arg4: memref<2xi32, #tpu.memory_space<smem>>) -> (i32, i32) {
    %c1_i32 = arith.constant 1 : i32
    %0 = arith.muli %arg0, %c1_i32 : i32
    %1 = arith.addi %0, %arg1 : i32
    %2 = arith.index_cast %1 : i32 to index
    %3 = memref.load %arg2[%2] : memref<2xi32, #tpu.memory_space<smem>>
    %c0_i32 = arith.constant 0 : i32
    %c0_i32_0 = arith.constant 0 : i32
    return %3, %c0_i32 : i32, i32
  }
  func.func @transform_1(%arg0: i32, %arg1: i32, %arg2: memref<2xi32, #tpu.memory_space<smem>>, %arg3: memref<2xi32, #tpu.memory_space<smem>>, %arg4: memref<2xi32, #tpu.memory_space<smem>>) -> (i32, i32) {
    %c1_i32 = arith.constant 1 : i32
    %0 = arith.muli %arg0, %c1_i32 : i32
    %1 = arith.addi %0, %arg1 : i32
    %2 = arith.index_cast %1 : i32 to index
    %3 = memref.load %arg3[%2] : memref<2xi32, #tpu.memory_space<smem>>
    %c0_i32 = arith.constant 0 : i32
    %c0_i32_0 = arith.constant 0 : i32
    return %3, %c0_i32 : i32, i32
  }
  func.func @transform_2(%arg0: i32, %arg1: i32, %arg2: memref<2xi32, #tpu.memory_space<smem>>, %arg3: memref<2xi32, #tpu.memory_space<smem>>, %arg4: memref<2xi32, #tpu.memory_space<smem>>) -> (i32, i32) {
    %c1_i32 = arith.constant 1 : i32
    %0 = arith.muli %arg0, %c1_i32 : i32
    %1 = arith.addi %0, %arg1 : i32
    %2 = arith.index_cast %1 : i32 to index
    %3 = memref.load %arg2[%2] : memref<2xi32, #tpu.memory_space<smem>>
    %c0_i32 = arith.constant 0 : i32
    %c0_i32_0 = arith.constant 0 : i32
    return %3, %c0_i32 : i32, i32
  }
  func.func @transform_3(%arg0: i32, %arg1: i32, %arg2: memref<2xi32, #tpu.memory_space<smem>>, %arg3: memref<2xi32, #tpu.memory_space<smem>>, %arg4: memref<2xi32, #tpu.memory_space<smem>>) -> (i32, i32) {
    %c1_i32 = arith.constant 1 : i32
    %0 = arith.muli %arg0, %c1_i32 : i32
    %1 = arith.addi %0, %arg1 : i32
    %2 = arith.index_cast %1 : i32 to index
    %3 = memref.load %arg3[%2] : memref<2xi32, #tpu.memory_space<smem>>
    %c0_i32 = arith.constant 0 : i32
    %c0_i32_0 = arith.constant 0 : i32
    return %c0_i32, %3 : i32, i32
  }
  func.func @transform_4(%arg0: i32, %arg1: i32, %arg2: memref<2xi32, #tpu.memory_space<smem>>, %arg3: memref<2xi32, #tpu.memory_space<smem>>, %arg4: memref<2xi32, #tpu.memory_space<smem>>) -> (i32, i32) {
    %c0_i32 = arith.constant 0 : i32
    %c0_i32_0 = arith.constant 0 : i32
    return %arg0, %c0_i32 : i32, i32
  }
}

</mosaic_0001>

<bundles_post_ra>
// kernel: tpu_custom_call.1
= control target key start
LH: loop header
LB: loop body
LE: loop exit
PB: predicated region body
PF: predicated region fallthrough
CT: control target
= control target key end

     0   :  { %s2045_s0 = inlined_call_operand.vmem [shape: s32[2], index: 0, kind: input, shape index: {}]   ;;  %s2046_s3 = inlined_call_operand.vmem [shape: f32[128,128], index: 3, kind: input, shape index: {}]   ;;  %s2047_s4 = inlined_call_operand.hbm [shape: f32[128,128], index: 4, kind: input, shape index: {}]   ;;  %s2048_s5 = inlined_call_operand.vmem [shape: f32[128,1], index: 5, kind: input, shape index: {}]   ;;  %s2049_s6 = inlined_call_operand.vmem [shape: f32[1,128], index: 6, kind: input, shape index: {}]   ;;  %s2050_s7 = inlined_call_operand.hbm [shape: f32[16,128], index: 7, kind: output, shape index: {}]   ;;  %s2051_s1 = inlined_call_operand.vmem [shape: s32[2], index: 1, kind: input, shape index: {}]   ;;  %s2052_s2 = inlined_call_operand.vmem [shape: s32[2], index: 2, kind: input, shape index: {}]  }
   0x1   :  { %2058 = sst [smem:[#allocation18_spill]] %s2047_s4  ;;  %s12_s26 = sshll.u32 %s2045_s0, 4  ;;  %s13_s26 = int_to_ptr.vmem [resolvable:$true] %s12_s26 }
   0x2   :  { %s16_s29 = sshll.u32 %s2051_s1, 4  ;;  %s1250_s30 = scalar_lea.vmem %s13_s26, 16  ;;  %s17_s29 = int_to_ptr.vmem [resolvable:$true] %s16_s29 }
   0x3   :  { %p1251_p0 = scmp.ne.s32.totalorder %s13_s26, %s1250_s30  ;;  %p1255_p1 = scmp.lt.s32.totalorder %s13_s26, %s13_s26 }
   0x4   :  { %p1256_p2 = scmp.lt.s32.totalorder %s1250_s30, %s1250_s30 }
   0x6   :  { %p1257_p3 = por %p1256_p2, %p1255_p1 }
   0x8   :  { %p1258_p4 = pnand %p1257_p3, %p1251_p0 }
   0xa   :  { %1261 = shalt.err (!%p1258_p4)  }
   0xb   :  { %s1426_s8 = smov [#allocation3]   ;;  %s1262_s9 = scalar_lea.vmem %s17_s29, 16 }
   0xc   :  { %15 = dma.vmem_to_smem %s13_s26, 16, %s1426_s8, [#allocation2] }
   0xd   :  { %p1263_p5 = scmp.ne.s32.totalorder %s17_s29, %s1262_s9  ;;  %p1267_p6 = scmp.lt.s32.totalorder %s17_s29, %s17_s29 }
   0xe   :  { %p1268_p7 = scmp.lt.s32.totalorder %s1262_s9, %s1262_s9 }
  0x10   :  { %p1269_p8 = por %p1268_p7, %p1267_p6 }
  0x12   :  { %p1270_p9 = pnand %p1269_p8, %p1263_p5 }
  0x14   :  { %1273 = shalt.err (!%p1270_p9)  }
  0x15   :  { %s1427_s0 = smov [#allocation4]   ;;  %s20_s11 = sshll.u32 %s2052_s2, 4  ;;  %s21_s11 = int_to_ptr.vmem [resolvable:$true] %s20_s11 }
  0x16   :  { %19 = dma.vmem_to_smem %s17_s29, 16, %s1427_s0, [#allocation2] }
  0x17   :  { %s1274_s12 = scalar_lea.vmem %s21_s11, 16  ;;  %p1279_p11 = scmp.lt.s32.totalorder %s21_s11, %s21_s11 }
  0x18   :  { %p1275_p10 = scmp.ne.s32.totalorder %s21_s11, %s1274_s12  ;;  %p1280_p12 = scmp.lt.s32.totalorder %s1274_s12, %s1274_s12 }
  0x1a   :  { %p1281_p13 = por %p1280_p12, %p1279_p11 }
  0x1c   :  { %p1282_p0 = pnand %p1281_p13, %p1275_p10 }
  0x1e   :  { %1285 = shalt.err (!%p1282_p0)  }
  0x1f   :  { %s1428_s13 = smov [#allocation5]  }
  0x20   :  { %23 = dma.vmem_to_smem %s21_s11, 16, %s1428_s13, [#allocation2] }
  0x21   :  { %1380 = dma.done.wait [#allocation2], 48 }
  0x22   :  { %1381 = vsyncadd [#allocation2], 4294967248 }
  0x23   :  { %25 = sfence }
  0x24   :  { %26 = vsyncpa [#allocation7], 0 }
  0x25   :  { %28 = vsyncpa [#allocation7 + $0x1], 0 }
  0x26   :  { %29 = vsyncpa [#allocation8], 0 }
  0x27   :  { %31 = vsyncpa [#allocation8 + $0x1], 0  ;;  %s1485_s14 = smov 0   ;;  %s1487_s2 = smov 0  }
  0x28   :  { %s1489_s15 = smov 0   ;;  %s1491_s16 = smov 0  }
  0x29   :  { %s1493_s17 = smov 0   ;;  %s1495_s18 = smov 0  }
  0x2a   :  { %s1497_s19 = smov 0   ;;  %s1499_s20 = smov 0  }
  0x2b   :  { %s1501_s21 = smov 0  }
  0x2c LB: > { %2059 = sst [smem:[#allocation15_spill]] %s1420_s20  ;;  %s990_s22 = sadd.s32 4294967295, %s1424_s21   ;;  %s1424_s21 = sphi %s1501_s21, %s37_s21   ;;  %s1420_s20 = sphi %s1499_s20, %s2096_s20   ;;  %s1416_s19 = sphi %s1497_s19, %s2095_s19   ;;  %s1412_s18 = sphi %s1495_s18, %s2102_s18   ;;  %s1408_s17 = sphi %s1493_s17, %s2101_s17   ;;  %s1404_s16 = sphi %s1491_s16, %s2100_s16   ;;  %s1400_s15 = sphi %s1489_s15, %s2099_s15   ;;  %s1396_s2 = sphi %s1487_s2, %s2098_s2   ;;  %s1392_s14 = sphi %s1485_s14, %s2097_s14  }
  0x2d   : > { %s991_s23 = sadd.s32 4294967294, %s1424_s21   ;;  %s49_s24 = sadd.s32 1, %s1420_s20 }
  0x2e   : > { %s84_s25 = sld [smem:[#allocation4 + %s1420_s20]]  ;;  %p51_p1 = scmp.ge.s32.totalorder %s49_s24, 2 }
  0x2f   : > { %s90_s26 = sadd.s32 1, %s1412_s18  ;;  %p97_p2 = scmp.ne.s32.totalorder %s1412_s18, %s1408_s17 }
  0x30   : > { %p98_p3 = scmp.eq.s32.totalorder %s1424_s21, 0  ;;  %s2104_s24 = smov (%p51_p1, %s49_s24), 0 }
  0x31   : > { %2060 = sst [smem:[#allocation16_spill]] %s2104_s24  ;;  %p103_p5 = scmp.ne.s32.totalorder %s1408_s17, %s1404_s16 }
  0x32   : > { %p1538_p4 = por %p98_p3, %p97_p2  ;;  %s86_s28 = sld [smem:[#allocation4 + %s2104_s24]] }
  0x33   : > { %p104_p6 = scmp.eq.s32.totalorder %s990_s22, 0  ;;  %s173_s29 = ssub.s32 %s1420_s20, %s2104_s24 }
  0x34   : > { %s176_s30 = sadd.s32 1, %s1400_s15  ;;  %p174_p8 = scmp.eq.s32.totalorder %s173_s29, 0 }
  0x35   : > { %p1547_p7 = por %p104_p6, %p103_p5  ;;  %p186_p9 = scmp.ne.s32.totalorder %s1400_s15, %s1396_s2 }
  0x36   : > { %p187_p10 = scmp.eq.s32.totalorder %s990_s22, 1  ;;  %p192_p12 = scmp.ne.s32.totalorder %s1396_s2, %s1392_s14 }
  0x37   : > { %s2062_s8 = scalar_select %p1547_p7, 1, 0 }
  0x38   : > { %s1554_s9 = scalar_select %p174_p8, %s1400_s15, %s176_s30  }
  0x39   : > { %p1556_p11 = por %p187_p10, %p186_p9  ;;  %s87_s1 = ssub.s32 %s84_s25, %s86_s28 }
  0x3a   : > { %p193_p13 = scmp.eq.s32.totalorder %s991_s23, 1  ;;  %p88_p0 = scmp.eq.s32.totalorder %s87_s1, 0 }
  0x3b   : > { %s2063_s0 = scalar_select %p1556_p11, 1, 0 }
  0x3c   : > { %p1563_p2 = por %p193_p13, %p192_p12  ;;  %p1166_p3 = scmp.lt.s32.totalorder %s1424_s21, 2 }
  0x3d   : > { %s1569_s11 = scalar_select %p88_p0, %s1412_s18, %s90_s26  }
  0x3e   : > { %s2064_s10 = scalar_select %p1563_p2, 1, 0 }
  0x3f   : > { %2065 = sst [smem:[#allocation17_spill]] %s1569_s11  ;;  %s226_s12 = sand.u32 1, %s1412_s18  }
  0x40   : > { %p1574_p5 = pnand %p1166_p3, %p1538_p4  ;;  %s994_s16 = sshll.u32 %s226_s12, 7 }
  0x41   : > { %s1150_s22 = scalar_select %p1538_p4, [#allocation4], [#allocation10] }
  0x42   : > { %s1151_s23 = scalar_select %p1538_p4, %s1420_s20, 0 }
  0x43   : > { %s2106_s22 = smov (!%p1166_p3, %s1150_s22), [#allocation11]  ;;  %p997_p6 = scmp.ge.s32.totalorder %s1424_s21, 1 }
  0x44   : > { %s2108_s23 = smov (!%p1166_p3, %s1151_s23), 0  ;;  %s230_s28 = scalar_lea.vmem [#allocation6], %s994_s16 }
  0x45   : > { %s232_s25 = sld [smem:[%s2106_s22 + %s2108_s23]]  ;;  %s239_s26 = sshll.u32 %s230_s28, 4  ;;  %s1589_s26 = int_to_ptr.vmem [resolvable:$true] %s239_s26 }
  0x46   : > { %p270_p8 = scmp.lt.s32.totalorder %s1424_s21, 3  ;;  %s2068_s4 = sld [smem:[#allocation18_spill]] }
  0x47   : > { %s1596_s22 = scalar_lea.sflag [#allocation7], %s226_s12  ;;  %p1288_p10 = pneg %p1574_p5 }
  0x48   : > { %p1585_p9 = pnand %p997_p6, %p270_p8 }
  0x4b   : > { %s1011_s30 = sshll.u32 %s232_s25, 11 }
  0x4c   : > { %s1594_s27 = scalar_lea.hbm %s2068_s4, %s1011_s30  ;;  %s1291_s24 = scalar_lea.hbm %s2068_s4, 2048 }
  0x4d   : > { %s1286_s16 = scalar_lea.hbm %s1594_s27, 2048  ;;  %p1292_p0 = scmp.lt.u32.totalorder %s1594_s27, %s2068_s4 }
  0x4e   : > { %p1287_p4 = scmp.ne.s32.totalorder %s1594_s27, %s1286_s16  ;;  %p1293_p3 = scmp.lt.u32.totalorder %s1291_s24, %s1286_s16 }
  0x4f   : > { %p1295_p8 = scmp.lt.u32.totalorder %s1286_s16, %s1594_s27 }
  0x50   : > { %p1289_p12 = pnand %p1288_p10, %p1287_p4  ;;  %p1294_p6 = por %p1293_p3, %p1292_p0 }
  0x52   : > { %p1290_p13 = pneg %p1289_p12  ;;  %p1296_p1 = por %p1295_p8, %p1294_p6 }
  0x54   : > { %p1297_p2 = pnand %p1296_p1, %p1290_p13 }
  0x56   : > { %1300 = shalt.err (!%p1297_p2)
}
  0x57   : > { %s1301_s12 = scalar_lea.vmem %s1589_s26, 2048  ;;  %s1429_s1 = smov [#allocation6]  }
  0x58   : > { %p1302_p4 = scmp.ne.s32.totalorder %s1589_s26, %s1301_s12  ;;  %s1306_s23 = sshll.u32 %s1429_s1, 4  ;;  %s1307_s23 = int_to_ptr.vmem [resolvable:$false] %s1306_s23 }
  0x59   : > { %s1308_s25 = scalar_lea.vmem %s1307_s23, 4096  ;;  %p1309_p7 = scmp.lt.s32.totalorder %s1589_s26, %s1307_s23 }
  0x5a   : > { %p1304_p12 = pnand %p1302_p4, %p1288_p10  ;;  %p1310_p0 = scmp.lt.s32.totalorder %s1308_s25, %s1301_s12 }
  0x5c   : > { %p1305_p11 = pneg %p1304_p12  ;;  %p1311_p3 = por %p1310_p0, %p1309_p7 }
  0x5e   : > { %p1312_p6 = pnand %p1311_p3, %p1305_p11 }
  0x60   : > { %1315 = shalt.err (!%p1312_p6)
}
  0x61   : > { %s1430_s16 = smov 128   ;;  %s1431_s24 = smov 8  }
  0x62   : > { %1161 = dma.hbm_to_vmem [thread:$0]  (!%p1574_p5), %s1594_s27, 2048, %s1589_s26, %s1596_s22, %s1430_s16, %s1430_s16, %s1431_s24  }
  0x63   : > { %274 = sbr.rel (%p1585_p9) target bundleno = 673 (0x2a1), region = 36  ;;  %s276_s28 = sand.u32 (!%p1585_p9), 1, %s1408_s17  }
  0x64   : > { %s998_s30 = sshll.u32 (!%p1585_p9), %s276_s28, 7  ;;  %s277_s1 = scalar_lea.sflag (!%p1585_p9), [#allocation7], %s276_s28 }
  0x65   : > { %s1627_s12 = scalar_lea.vmem (!%p1585_p9), [#allocation6], %s998_s30  ;;  %p2069_p7 = scmp.ne.s32.totalorder (!%p1585_p9), %s2062_s8, 0 }
  0x6a   : > { %1383 = dma.done.wait (%p2069_p7), %s277_s1, 2048  }
  0x6b   : > { %1385 = vsyncadd (%p2069_p7), %s277_s1, 4294965248  ;;  %s2056_s13 = sand.u32 1, %s1396_s2   ;;  %s325_s26 = sld [smem:[#allocation3 + %s1416_s19]]  ;;  %v1432_v0 = vmov 0.0  }
  0x6c   : > { %s338_s29 = sld [smem:[#allocation3 + %s1416_s19]]  ;;  %s999_s23 = sshll.u32 %s2056_s13, 3 }
  0x6d   : > { %s348_s27 = sld [smem:[#allocation4 + %s1416_s19]]  ;;  %s1642_s25 = scalar_lea.vmem [#allocation9], %s999_s23 }
  0x6e   : > { %s1638_s22 = sld [smem:[#allocation5 + %s1416_s19]]  ;;  %359 = vst [vmem:[%s1642_s25] sm:$0xff] %v1432_v0 }
  0x71   : > { %s1000_s8 = sshll.u32 %s325_s26, 4 }
  0x72   : > { %s1002_s16 = sshll.u32 %s338_s29, 4  ;;  %p327_p11 = scmp.lt.s32.totalorder %s1000_s8, 15 }
  0x73   : > { %p340_p1 = scmp.lt.s32.totalorder %s1002_s16, 15  ;;  %p349_p2 = scmp.lt.s32.totalorder %s348_s27, 0 }
  0x74   : > { %s2110_s8 = smov (!%p327_p11, %s1000_s8), 15  ;;  %p1004_p5 = scmp.le.s32.totalorder %s1638_s22, 0 }
  0x75   : > { %s2112_s16 = smov (!%p340_p1, %s1002_s16), 15  ;;  %s1001_s24 = sshll.u32 %s2110_s8, 3  ;;  %v386_v1 = vld [vmem:[%s1627_s12] sm:$0xff] (!%p1004_p5)  ;;  %v387_v2 = vld [vmem:[%s1627_s12 + $0x8] sm:$0xff] (!%p1004_p5)  ;;  %v388_v3 = vld [vmem:[%s1627_s12 + $0x10] sm:$0xff] (!%p1004_p5)  ;;  %v1433_v6 = vmov (!%p1004_p5), 0   ;;  %v682_v58 = vlaneseq (!%p1004_p5) }
  0x76   : > { %s1648_s1 = scalar_lea.vmem %s2046_s3, %s1001_s24  ;;  %s1003_s4 = sshll.u32 %s2112_s16, 3  ;;  %v1100_v4 = vpack.c.bf16 (!%p1004_p5), %v387_v2, %v386_v1  ;;  %v389_v5 = vld [vmem:[%s1627_s12 + $0x18] sm:$0xff] (!%p1004_p5)  ;;  %1248 = vset.pattern.permute.xlu0 (!%p1004_p5), %v1433_v6  ;;  %1249 = vset.pattern.permute.xlu1 (!%p1004_p5), %v1433_v6  ;;  %v390_v10 = vld [vmem:[%s1627_s12 + $0x20] sm:$0xff] (!%p1004_p5)  ;;  %v391_v11 = vld [vmem:[%s1627_s12 + $0x28] sm:$0xff] (!%p1004_p5) }
  0x77   : > { %s1653_s20 = scalar_lea.vmem %s2048_s5, %s1003_s4  ;;  %s2114_s27 = smov (!%p349_p2, %s348_s27), 0  ;;  %v1104_v7 = vpack.c.bf16 (!%p1004_p5), %v389_v5, %v388_v3  ;;  %v370_v8 = vld [vmem:[%s1648_s1] sm:$0xff] (!%p1004_p5)  ;;  %v1108_v12 = vpack.c.bf16 (!%p1004_p5), %v391_v11, %v390_v10  ;;  %v392_v16 = vld [vmem:[%s1627_s12 + $0x30] sm:$0xff] (!%p1004_p5)  ;;  %v393_v17 = vld [vmem:[%s1627_s12 + $0x38] sm:$0xff] (!%p1004_p5)  ;;  %v1712_v59 = vshrl.u32 (!%p1004_p5), %v682_v58, 7 }
  0x78   : > { %s351_s11 = scalar_lea.vmem %s2049_s6, %s2114_s27  ;;  %364 = sbr.rel (%p1004_p5) target bundleno = 647 (0x287), region = 48  ;;  %1101 = vmatprep.subr.bf16.mxu0 (!%p1004_p5), %v1100_v4  ;;  %1132 = vmatprep.subr.bf16.mxu1 (!%p1004_p5), %v1100_v4  ;;  %v378_v9 = vld [vmem:[%s1648_s1 + $0x40] sm:$0xff] (!%p1004_p5)  ;;  %v549_v14 = vld [vmem:[%s1653_s20 + $0x10] sm:$0xff] (!%p1004_p5)  ;;  %v548_v15 = vld [vmem:[%s1653_s20 + $0x8] sm:$0xff] (!%p1004_p5)  ;;  %v1112_v20 = vpack.c.bf16 (!%p1004_p5), %v393_v17, %v392_v16 }
  0x79   : > { %1103 = vmatpush3.bf16.xpose.msra.mxu0 (!%p1004_p5), %v1100_v4  ;;  %1140 = vmatpush3.bf16.xpose.msra.mxu1 (!%p1004_p5), %v1100_v4  ;;  %v547_v13 = vld [vmem:[%s1653_s20] sm:$0xff] (!%p1004_p5)  ;;  %v550_v18 = vld [vmem:[%s1653_s20 + $0x18] sm:$0xff] (!%p1004_p5)  ;;  %v552_v21 = vld [vmem:[%s1653_s20 + $0x28] sm:$0xff] (!%p1004_p5)  ;;  %s365_s4 = sld [smem:[#allocation3 + %s1416_s19]] (!%p1004_p5)  ;;  %v684_v62 = vadd.s32 (!%p1004_p5), 8, %v1712_v59  ;;  %v691_v0 = vadd.s32 (!%p1004_p5), 64, %v1712_v59 }
  0x7a   : > { %1105 = vmatprep.subr.bf16.mxu0 (!%p1004_p5), %v1104_v7  ;;  %1133 = vmatprep.subr.bf16.mxu1 (!%p1004_p5), %v1104_v7  ;;  %v551_v19 = vld [vmem:[%s1653_s20 + $0x20] sm:$0xff] (!%p1004_p5)  ;;  %v553_v22 = vld [vmem:[%s1653_s20 + $0x30] sm:$0xff] (!%p1004_p5)  ;;  %v395_v24 = vld [vmem:[%s1627_s12 + $0x48] sm:$0xff] (!%p1004_p5)  ;;  %v692_v1 = vadd.s32 (!%p1004_p5), 72, %v1712_v59  ;;  %v1727_v4 = vand.u32 (!%p1004_p5), 127, %v682_v58  ;;  %v686_v6 = vadd.s32 (!%p1004_p5), 24, %v1712_v59 }
  0x7b   : > { %1076 = vmatprep.mubr.f32.mxu0 (!%p1004_p5), %v370_v8  ;;  %1088 = vmatprep.mubr.f32.mxu1 (!%p1004_p5), %v378_v9  ;;  %v394_v23 = vld [vmem:[%s1627_s12 + $0x40] sm:$0xff] (!%p1004_p5)  ;;  %v554_v25 = vld [vmem:[%s1653_s20 + $0x38] sm:$0xff] (!%p1004_p5)  ;;  %v556_v28 = vld [vmem:[%s1653_s20 + $0x48] sm:$0xff] (!%p1004_p5)  ;;  %v685_v10 = vadd.s32 (!%p1004_p5), 16, %v1712_v59  ;;  %v688_v16 = vadd.s32 (!%p1004_p5), 40, %v1712_v59 }
  0x7c   : > { %565 = vperm.xlu0 (!%p1004_p5), %1248, %v547_v13   ;;  %575 = vperm.xlu1 (!%p1004_p5), %1249, %v549_v14   ;;  %v555_v26 = vld [vmem:[%s1653_s20 + $0x40] sm:$0xff] (!%p1004_p5)  ;;  %v1116_v27 = vpack.c.bf16 (!%p1004_p5), %v395_v24, %v394_v23  ;;  %v557_v29 = vld [vmem:[%s1653_s20 + $0x50] sm:$0xff] (!%p1004_p5)  ;;  %v397_v31 = vld [vmem:[%s1627_s12 + $0x58] sm:$0xff] (!%p1004_p5)  ;;  %vm702_vm0 = vcmp.eq.s32.totalorder (!%p1004_p5), %v684_v62, %v1727_v4  ;;  %vm701_vm2 = vcmp.eq.s32.totalorder (!%p1004_p5), %v1712_v59, %v1727_v4  ;;  %v693_v13 = vadd.s32 (!%p1004_p5), 80, %v1712_v59 }
  0x7d   : > { %v396_v30 = vld [vmem:[%s1627_s12 + $0x50] sm:$0xff] (!%p1004_p5)  ;;  %v558_v32 = vld [vmem:[%s1653_s20 + $0x58] sm:$0xff] (!%p1004_p5)  ;;  %v559_v33 = vld [vmem:[%s1653_s20 + $0x60] sm:$0xff] (!%p1004_p5)  ;;  %vm709_vm4 = vcmp.eq.s32.totalorder (!%p1004_p5), %v691_v0, %v1727_v4  ;;  %vm710_vm7 = vcmp.eq.s32.totalorder (!%p1004_p5), %v692_v1, %v1727_v4  ;;  %vm704_vm10 = vcmp.eq.s32.totalorder (!%p1004_p5), %v686_v6, %v1727_v4  ;;  %v1434_v23 = vmov (!%p1004_p5), 0.0  }
  0x7e   : > { %v1120_v34 = vpack.c.bf16 (!%p1004_p5), %v397_v31, %v396_v30  ;;  %v560_v35 = vld [vmem:[%s1653_s20 + $0x68] sm:$0xff] (!%p1004_p5)  ;;  %v561_v36 = vld [vmem:[%s1653_s20 + $0x70] sm:$0xff] (!%p1004_p5)  ;;  %v398_v37 = vld [vmem:[%s1627_s12 + $0x60] sm:$0xff] (!%p1004_p5)  ;;  %vm703_vm15 = vcmp.eq.s32.totalorder (!%p1004_p5), %v685_v10, %v1727_v4 }
  0x7f   : > { %v399_v38 = vld [vmem:[%s1627_s12 + $0x68] sm:$0xff]  ;;  %v562_v39 = vld [vmem:[%s1653_s20 + $0x78] sm:$0xff]  ;;  %v400_v41 = vld [vmem:[%s1627_s12 + $0x70] sm:$0xff]  ;;  %s366_s20 = sld [smem:[#allocation4 + %s1416_s19]] }
  0x80   : > { %570 = vperm.xlu0 %1248, %v548_v15   ;;  %580 = vperm.xlu1 %1249, %v550_v18   ;;  %v1124_v40 = vpack.c.bf16 %v399_v38, %v398_v37  ;;  %v401_v42 = vld [vmem:[%s1627_s12 + $0x78] sm:$0xff]  ;;  %v371_v44 = vld [vmem:[%s1648_s1 + $0x8] sm:$0xff]  ;;  %v372_v46 = vld [vmem:[%s1648_s1 + $0x10] sm:$0xff]  ;;  %s1006_s12 = sshll.u32 %s365_s4, 7  ;;  %v687_v18 = vadd.s32 32, %v1712_v59 }
  0x81   : > { %1107 = vmatpush3.bf16.xpose.msra.mxu0 %v1104_v7  ;;  %1141 = vmatpush3.bf16.xpose.msra.mxu1 %v1104_v7  ;;  %v1128_v43 = vpack.c.bf16 %v401_v42, %v400_v41  ;;  %v379_v45 = vld [vmem:[%s1648_s1 + $0x48] sm:$0xff]  ;;  %v380_v47 = vld [vmem:[%s1648_s1 + $0x50] sm:$0xff]  ;;  %v373_v48 = vld [vmem:[%s1648_s1 + $0x18] sm:$0xff]  ;;  %v1719_v63 = vstv %s1006_s12 }
  0x82   : > { %1109 = vmatprep.subr.bf16.mxu0 %v1108_v12  ;;  %1134 = vmatprep.subr.bf16.mxu1 %v1108_v12  ;;  %v381_v49 = vld [vmem:[%s1648_s1 + $0x58] sm:$0xff]  ;;  %v374_v50 = vld [vmem:[%s1648_s1 + $0x20] sm:$0xff]  ;;  %v375_v52 = vld [vmem:[%s1648_s1 + $0x28] sm:$0xff]  ;;  %v720_v5 = vadd.s32 %v1719_v63, %v684_v62  ;;  %v719_v7 = vadd.s32 %v1719_v63, %v1712_v59  ;;  %v727_v8 = vadd.s32 %v1719_v63, %v691_v0  ;;  %v1862_v0 = vadd.s32 96, %v1712_v59 }
  0x83   : > { %v382_v51 = vld [vmem:[%s1648_s1 + $0x60] sm:$0xff]  ;;  %v383_v53 = vld [vmem:[%s1648_s1 + $0x68] sm:$0xff]  ;;  %v376_v54 = vld [vmem:[%s1648_s1 + $0x30] sm:$0xff]  ;;  %v728_v9 = vadd.s32 %v1719_v63, %v692_v1  ;;  %v722_v11 = vadd.s32 %v1719_v63, %v686_v6  ;;  %v721_v17 = vadd.s32 %v1719_v63, %v685_v10 }
  0x84   : > { %585 = vperm.xlu0 %1248, %v551_v19   ;;  %590 = vperm.xlu1 %1249, %v552_v21   ;;  %v384_v55 = vld [vmem:[%s1648_s1 + $0x70] sm:$0xff]  ;;  %v377_v56 = vld [vmem:[%s1648_s1 + $0x38] sm:$0xff]  ;;  %vm736_vm1 = vcmp.lt.s32.totalorder %v720_v5, 32  ;;  %vm735_vm3 = vcmp.lt.s32.totalorder %v719_v7, 32  ;;  %vm743_vm5 = vcmp.lt.s32.totalorder %v727_v8, 32 }
  0x85   : > { %v385_v57 = vld [vmem:[%s1648_s1 + $0x78] sm:$0xff]  ;;  %p367_p9 = scmp.eq.s32.totalorder %s365_s4, %s366_s20  ;;  %vm752_vm6 = vmand %vm702_vm0, %vm736_vm1  ;;  %vm744_vm8 = vcmp.lt.s32.totalorder %v728_v9, 32  ;;  %vm738_vm11 = vcmp.lt.s32.totalorder %v722_v11, 32  ;;  %vm737_vm0 = vcmp.lt.s32.totalorder %v721_v17, 32 }
  0x86   : > { %vm1754_vm9 = vmand %vm701_vm2, %vm735_vm3  ;;  %v768_v24 = vsel %vm752_vm6, 1.0, %v1434_v23  ;;  %vm711_vm3 = vcmp.eq.s32.totalorder %v693_v13, %v1727_v4  ;;  %vm706_vm6 = vcmp.eq.s32.totalorder %v688_v16, %v1727_v4 }
  0x87   : > { %s1733_s13 = scalar_select %p367_p9, 1, 0  ;;  %vm1760_vm12 = vmand %vm709_vm4, %vm743_vm5 }
  0x88   : > { %595 = vperm.xlu0 %1248, %v553_v22   ;;  %600 = vperm.xlu1 %1249, %v554_v25   ;;  %v729_v22 = vadd.s32 %v1719_v63, %v693_v13  ;;  %vm760_vm13 = vmand %vm710_vm7, %vm744_vm8 }
  0x89   : > { %1111 = vmatpush3.bf16.xpose.msra.mxu0 %v1108_v12  ;;  %1142 = vmatpush3.bf16.xpose.msra.mxu1 %v1108_v12  ;;  %v694_v12 = vadd.s32 88, %v1712_v59  ;;  %s369_s8 = scvt.s32.f32 %s1733_s13  ;;  %vm754_vm14 = vmand %vm704_vm10, %vm738_vm11 }
  0x8a   : > { %1113 = vmatprep.subr.bf16.mxu0 %v1112_v20  ;;  %1135 = vmatprep.subr.bf16.mxu1 %v1112_v20  ;;  %vm745_vm4 = vcmp.lt.s32.totalorder %v729_v22, 32  ;;  %vm1796_vm5 = vmand %vm703_vm15, %vm737_vm0 }
  0x8b   : > { %v1766_v25 = vstv %s369_s8  ;;  %vm712_vm1 = vcmp.eq.s32.totalorder %v694_v12, %v1727_v4  ;;  %vm1833_vm11 = vmand %vm711_vm3, %vm745_vm4 }
  0x8c   : > { %605 = vperm.xlu0 %1248, %v555_v26   ;;  %610 = vperm.xlu1 %1249, %v556_v28   ;;  %v724_v26 = vadd.s32 %v1719_v63, %v688_v16  ;;  %v723_v28 = vadd.s32 %v1719_v63, %v687_v18  ;;  %v785_v41 = vmul.f32 %v1766_v25, %v768_v24  ;;  %v777_v17 = vsel %vm1833_vm11, 1.0, %v1434_v23 }
  0x8e   : > { %vm740_vm7 = vcmp.lt.s32.totalorder %v724_v26, 32  ;;  %vm739_vm10 = vcmp.lt.s32.totalorder %v723_v28, 32 }
  0x90   : > { %615 = vperm.xlu0 %1248, %v557_v29   ;;  %620 = vperm.xlu1 %1249, %v558_v32   ;;  %v1775_v29 = vadd.s32 48, %v1712_v59  ;;  %v767_v32 = vsel %vm1754_vm9, 1.0, %v1434_v23  ;;  %vm705_vm9 = vcmp.eq.s32.totalorder %v687_v18, %v1727_v4 }
  0x91   : > { %1115 = vmatpush3.bf16.xpose.msra.mxu0 %v1112_v20  ;;  %1143 = vmatpush3.bf16.xpose.msra.mxu1 %v1112_v20  ;;  %v730_v20 = vadd.s32 %v1719_v63, %v694_v12 }
  0x92   : > { %1117 = vmatprep.subr.bf16.mxu0 %v1116_v27  ;;  %1136 = vmatprep.subr.bf16.mxu1 %v1116_v27  ;;  %vm707_vm0 = vcmp.eq.s32.totalorder %v1775_v29, %v1727_v4 }
  0x93   : > { %vm746_vm2 = vcmp.lt.s32.totalorder %v730_v20, 32 }
  0x94   : > { %625 = vperm.xlu0 %1248, %v559_v33   ;;  %630 = vperm.xlu1 %1249, %v560_v35   ;;  %v775_v33 = vsel %vm1760_vm12, 1.0, %v1434_v23  ;;  %v1791_v35 = vadd.s32 104, %v1712_v59  ;;  %vm1815_vm8 = vmand %vm712_vm1, %vm746_vm2 }
  0x95   : > { %vm1845_vm12 = vmand %vm706_vm6, %vm740_vm7  ;;  %v1872_v6 = vsel %vm1815_vm8, 1.0, %v1434_v23 }
  0x96   : > { %v772_v12 = vsel %vm1845_vm12, 1.0, %v1434_v23  ;;  %vm714_vm3 = vcmp.eq.s32.totalorder %v1791_v35, %v1727_v4 }
  0x98   : > { %635 = vperm.xlu0 %1248, %v561_v36   ;;  %640 = vperm.xlu1 %1249, %v562_v39   ;;  %v770_v36 = vsel %vm754_vm14, 1.0, %v1434_v23 }
  0x99   : > { %1119 = vmatpush3.bf16.xpose.msra.mxu0 %v1116_v27  ;;  %1144 = vmatpush3.bf16.xpose.msra.mxu1 %v1116_v27  ;;  %v1770_v27 = vadd.s32 56, %v1712_v59 }
  0x9a   : > { %1121 = vmatprep.subr.bf16.mxu0 %v1120_v34  ;;  %1137 = vmatprep.subr.bf16.mxu1 %v1120_v34 }
  0x9b   : > { %v726_v38 = vadd.s32 %v1719_v63, %v1770_v27  ;;  %vm708_vm14 = vcmp.eq.s32.totalorder %v1770_v27, %v1727_v4  ;;  %v789_v27 = vmul.f32 %v1766_v25, %v772_v12 }
  0x9d   : > { %vm742_vm15 = vcmp.lt.s32.totalorder %v726_v38, 32 }
  0x9e   : > { %vm1892_vm2 = vmand %vm708_vm14, %vm742_vm15 }
  0x9f   : > { %v774_v38 = vsel %vm1892_vm2, 1.0, %v1434_v23 }
  0xa1   : > { %1123 = vmatpush3.bf16.xpose.msra.mxu0 %v1120_v34  ;;  %1145 = vmatpush3.bf16.xpose.msra.mxu1 %v1120_v34  ;;  %v776_v34 = vsel %vm760_vm13, 1.0, %v1434_v23  ;;  %vm1857_vm13 = vmand %vm705_vm9, %vm739_vm10 }
  0xa2   : > { %1125 = vmatprep.subr.bf16.mxu0 %v1124_v40  ;;  %1138 = vmatprep.subr.bf16.mxu1 %v1124_v40  ;;  %v771_v18 = vsel %vm1857_vm13, 1.0, %v1434_v23 }
  0xa9   : > { %1127 = vmatpush3.bf16.xpose.msra.mxu0 %v1124_v40  ;;  %1146 = vmatpush3.bf16.xpose.msra.mxu1 %v1124_v40  ;;  %v1808_v40 = vld [vmem:[%s351_s11] ss:$0 sm:$0xff]  ;;  %s817_s11 = scvt.s32.f32 %s1638_s22 }
  0xaa   : > { %1129 = vmatprep.subr.bf16.mxu0 %v1128_v43  ;;  %1139 = vmatprep.subr.bf16.mxu1 %v1128_v43 }
  0xb1   : > { %1131 = vmatpush3.bf16.xpose.msra.mxu0 %v1128_v43  ;;  %1147 = vmatpush3.bf16.xpose.msra.mxu1 %v1128_v43 }
  0xb8   : > { %1077 = vmatmul.mubr.f32.vlgmr.msra.gmra.mrb[0].mxu0 %v371_v44  ;;  %1089 = vmatmul.mubr.f32.vlgmr.msra.gmra.mrb[0].mxu1 %v379_v45  ;;  %v725_v44 = vadd.s32 %v1719_v63, %v1775_v29  ;;  %v788_v29 = vmul.f32 %v1766_v25, %v771_v18 }
  0xb9   : > { %1079 = vmatprep.mubr.f32.mxu0 %v372_v46  ;;  %1091 = vmatprep.mubr.f32.mxu1 %v380_v47  ;;  %v1824_v46 = vmul.f32 %v1766_v25, %v776_v34 }
  0xba   : > { %vm741_vm1 = vcmp.lt.s32.totalorder %v725_v44, 32 }
  0xbb   : > { %vm1908_vm6 = vmand %vm707_vm0, %vm741_vm1 }
  0xbc   : > { %1080 = vmatmul.mubr.f32.gmra.mrb[2].mxu0 %v373_v48  ;;  %1092 = vmatmul.mubr.f32.gmra.mrb[2].mxu1 %v381_v49  ;;  %v784_v48 = vmul.f32 %v1766_v25, %v767_v32  ;;  %v697_v32 = vadd.s32 112, %v1712_v59  ;;  %v773_v44 = vsel %vm1908_vm6, 1.0, %v1434_v23 }
  0xbd   : > { %1082 = vmatprep.mubr.f32.mxu0 %v374_v50  ;;  %1094 = vmatprep.mubr.f32.mxu1 %v382_v51  ;;  %v1828_v50 = vmul.f32 %v1766_v25, %v775_v33  ;;  %v698_v51 = vadd.s32 120, %v1712_v59 }
  0xbe   : > { %vm715_vm9 = vcmp.eq.s32.totalorder %v697_v32, %v1727_v4 }
  0xbf   : > { %vm716_vm12 = vcmp.eq.s32.totalorder %v698_v51, %v1727_v4 }
  0xc0   : > { %1083 = vmatmul.mubr.f32.gmra.mrb[4].mxu0 %v375_v52  ;;  %1095 = vmatmul.mubr.f32.gmra.mrb[4].mxu1 %v383_v53  ;;  %v787_v53 = vmul.f32 %v1766_v25, %v770_v36 }
  0xc1   : > { %1085 = vmatprep.mubr.f32.mxu0 %v376_v54  ;;  %1097 = vmatprep.mubr.f32.mxu1 %v384_v55  ;;  %v769_v54 = vsel %vm1796_vm5, 1.0, %v1434_v23  ;;  %vm713_vm5 = vcmp.eq.s32.totalorder %v1862_v0, %v1727_v4  ;;  %v791_v55 = vmul.f32 %v1766_v25, %v774_v38 }
  0xc2   : > { %v786_v10 = vmul.f32 %v1766_v25, %v769_v54 }
  0xc4   : > { %1086 = vmatmul.mubr.f32.gmra.mrb[6].mxu0 %v377_v56  ;;  %1098 = vmatmul.mubr.f32.gmra.mrb[6].mxu1 %v385_v57  ;;  %v1851_v56 = vadd.s32 %v1719_v63, %v1791_v35 }
  0xc6   : > { %vm748_vm4 = vcmp.lt.s32.totalorder %v1851_v56, 32 }
  0xc7   : > { %vm1954_vm11 = vmand %vm714_vm3, %vm748_vm4 }
  0xfb   : > { %v1714_v60 = vpop.permute.xlu0 %565  ;;  %v1716_v61 = vpop.permute.xlu1 %575 }
  0xff   : > { %v1723_v2 = vpop.permute.xlu0 %570  ;;  %v1725_v3 = vpop.permute.xlu1 %580 }
 0x103   : > { %v1744_v14 = vpop.permute.xlu0 %585  ;;  %v1746_v15 = vpop.permute.xlu1 %590 }
 0x107   : > { %v1777_v30 = vpop.permute.xlu0 %595  ;;  %v1779_v31 = vpop.permute.xlu1 %600 }
 0x10b   : > { %v606_v57 = vpop.permute.xlu0 %605  ;;  %v611_v58 = vpop.permute.xlu1 %610 }
 0x18b   : > { %v1078_v39 = vpop.f32.mrb[0].mxu0  ;;  %v1811_v42 = vpop.f32.mrb[0].mxu1 }
 0x18c   : > { %v644_v45 = vmul.f32 %v1078_v39, %v1723_v2  ;;  %v468_v47 = vpop.f32.mrb[1].mxu0  ;;  %v508_v49 = vpop.f32.mrb[1].mxu1  ;;  %v652_v62 = vmul.f32 %v1811_v42, %v611_v58  ;;  %v734_v42 = vadd.s32 %v1719_v63, %v698_v51 }
 0x18d   : > { %v643_v52 = vmul.f32 %v1714_v60, %v468_v47  ;;  %v621_v47 = vpop.permute.xlu1 %620 }
 0x18e   : > { %v667_v60 = vmul.f32 %v1808_v40, %v644_v45  ;;  %v616_v45 = vpop.permute.xlu0 %615  ;;  %vm750_vm13 = vcmp.lt.s32.totalorder %v734_v42, 32 }
 0x18f   : > { %v666_v1 = vmul.f32 %v1808_v40, %v643_v52  ;;  %v1081_v2 = vpop.f32.mrb[2].mxu0  ;;  %v1867_v5 = vpop.f32.mrb[2].mxu1  ;;  %vm766_vm15 = vmand %vm716_vm12, %vm750_vm13 }
 0x190   : > { %v801_v7 = vsub.f32 %v667_v60, %v785_v41  ;;  %v646_v8 = vmul.f32 %v1081_v2, %v1725_v3  ;;  %v478_v9 = vpop.f32.mrb[3].mxu0  ;;  %v518_v11 = vpop.f32.mrb[3].mxu1  ;;  %v790_v2 = vmul.f32 %v1766_v25, %v773_v44 }
 0x191   : > { %v800_v13 = vsub.f32 %v666_v1, %v784_v48  ;;  %v645_v16 = vmul.f32 %v1716_v61, %v478_v9  ;;  %v731_v61 = vadd.s32 %v1719_v63, %v1862_v0  ;;  %v651_v48 = vmul.f32 %v606_v57, %v508_v49  ;;  %v631_v21 = vpop.permute.xlu1 %630 }
 0x192   : > { %v819_v19 = vmul.f32 %v801_v7, %v801_v7  ;;  %v669_v20 = vmul.f32 %v1808_v40, %v646_v8  ;;  %v653_v58 = vmul.f32 %v616_v45, %v518_v11 }
 0x193   : > { %v818_v22 = vmul.f32 %v800_v13, %v800_v13  ;;  %v668_v24 = vmul.f32 %v1808_v40, %v645_v16  ;;  %v1084_v26 = vpop.f32.mrb[4].mxu0  ;;  %v1914_v28 = vpop.f32.mrb[4].mxu1  ;;  %vm747_vm7 = vcmp.lt.s32.totalorder %v731_v61, 32  ;;  %v674_v12 = vmul.f32 %v1808_v40, %v651_v48 }
 0x194   : > { %v803_v33 = vsub.f32 %v669_v20, %v787_v53  ;;  %v648_v34 = vmul.f32 %v1084_v26, %v1746_v15  ;;  %v488_v36 = vpop.f32.mrb[5].mxu0  ;;  %v528_v37 = vpop.f32.mrb[5].mxu1  ;;  %v794_v13 = vmul.f32 %v1766_v25, %v777_v17  ;;  %vm763_vm8 = vmand %vm713_vm5, %vm747_vm7  ;;  %v654_v20 = vmul.f32 %v1867_v5, %v621_v47 }
 0x195   : > { %v834_v39 = vadd.f32 %v819_v19, %v818_v22  ;;  %v802_v41 = vsub.f32 %v668_v24, %v786_v10  ;;  %v647_v43 = vmul.f32 %v1744_v14, %v488_v36  ;;  %v733_v14 = vadd.s32 %v1719_v63, %v697_v32  ;;  %v626_v19 = vpop.permute.xlu0 %625  ;;  %v641_v45 = vpop.permute.xlu1 %640 }
 0x196   : > { %v671_v15 = vmul.f32 %v1808_v40, %v648_v34  ;;  %v821_v1 = vmul.f32 %v803_v33, %v803_v33  ;;  %v808_v22 = vsub.f32 %v674_v12, %v1828_v50  ;;  %v779_v5 = vsel %vm763_vm8, 1.0, %v1434_v23 }
 0x197   : > { %v820_v52 = vmul.f32 %v802_v41, %v802_v41  ;;  %v670_v53 = vmul.f32 %v1808_v40, %v647_v43  ;;  %v1087_v54 = vpop.f32.mrb[6].mxu0  ;;  %v1930_v60 = vpop.f32.mrb[6].mxu1  ;;  %vm749_vm10 = vcmp.lt.s32.totalorder %v733_v14, 32  ;;  %v676_v56 = vmul.f32 %v1808_v40, %v653_v58 }
 0x198   : > { %v650_v49 = vmul.f32 %v1087_v54, %v1779_v31  ;;  %v498_v57 = vpop.f32.mrb[7].mxu0  ;;  %v538_v7 = vpop.f32.mrb[7].mxu1  ;;  %v805_v8 = vsub.f32 %v671_v15, %v789_v27  ;;  %v655_v24 = vmul.f32 %v626_v19, %v528_v37  ;;  %vm765_vm14 = vmand %vm715_vm9, %vm749_vm10  ;;  %v795_v33 = vmul.f32 %v1766_v25, %v1872_v6 }
 0x199   : > { %v835_v59 = vadd.f32 %v834_v39, %v820_v52  ;;  %v804_v9 = vsub.f32 %v670_v53, %v788_v29  ;;  %v649_v10 = vmul.f32 %v1777_v30, %v498_v57  ;;  %v675_v30 = vmul.f32 %v1808_v40, %v652_v62  ;;  %v636_v38 = vpop.permute.xlu0 %635 }
 0x19a   : > { %v673_v16 = vmul.f32 %v1808_v40, %v650_v49  ;;  %v823_v17 = vmul.f32 %v805_v8, %v805_v8  ;;  %v780_v50 = vsel %vm1954_vm11, 1.0, %v1434_v23  ;;  %v677_v34 = vmul.f32 %v1808_v40, %v654_v20  ;;  %v816_v20 = vld [vmem:[%s1642_s25] sm:$0xff] }
 0x19b   : > { %v822_v18 = vmul.f32 %v804_v9, %v804_v9  ;;  %v836_v31 = vadd.f32 %v835_v59, %v821_v1  ;;  %v672_v3 = vmul.f32 %v1808_v40, %v649_v10  ;;  %v809_v27 = vsub.f32 %v675_v30, %v1824_v46 }
 0x19c   : > { %v807_v11 = vsub.f32 %v673_v16, %v791_v55  ;;  %v656_v36 = vmul.f32 %v1914_v28, %v631_v21  ;;  %v826_v39 = vmul.f32 %v808_v22, %v808_v22  ;;  %v796_v4 = vmul.f32 %v1766_v25, %v779_v5 }
 0x19d   : > { %v837_v0 = vadd.f32 %v836_v31, %v822_v18  ;;  %v806_v61 = vsub.f32 %v672_v3, %v790_v2  ;;  %v781_v46 = vsel %vm765_vm14, 1.0, %v1434_v23  ;;  %v810_v32 = vsub.f32 %v676_v56, %v794_v13 }
 0x19e   : > { %v825_v29 = vmul.f32 %v807_v11, %v807_v11  ;;  %v678_v6 = vmul.f32 %v1808_v40, %v655_v24  ;;  %v657_v43 = vmul.f32 %v636_v38, %v538_v7  ;;  %v827_v44 = vmul.f32 %v809_v27, %v809_v27 }
 0x19f   : > { %v824_v26 = vmul.f32 %v806_v61, %v806_v61  ;;  %v838_v35 = vadd.f32 %v837_v0, %v823_v17  ;;  %v797_v47 = vmul.f32 %v1766_v25, %v780_v50  ;;  %v782_v28 = vsel %vm766_vm15, 1.0, %v1434_v23 }
 0x1a0   : > { %v811_v48 = vsub.f32 %v677_v34, %v795_v33  ;;  %v679_v15 = vmul.f32 %v1808_v40, %v656_v36  ;;  %v658_v51 = vmul.f32 %v1930_v60, %v641_v45  ;;  %v798_v53 = vmul.f32 %v1766_v25, %v781_v46 }
 0x1a1   : > { %v839_v37 = vadd.f32 %v838_v35, %v824_v26  ;;  %v828_v54 = vmul.f32 %v810_v32, %v810_v32  ;;  %v812_v55 = vsub.f32 %v678_v6, %v796_v4  ;;  %v680_v62 = vmul.f32 %v1808_v40, %v657_v43 }
 0x1a2   : > { %v799_v1 = vmul.f32 %v1766_v25, %v782_v28  ;;  %v829_v49 = vmul.f32 %v811_v48, %v811_v48  ;;  %v813_v57 = vsub.f32 %v679_v15, %v797_v47  ;;  %v681_v2 = vmul.f32 %v1808_v40, %v658_v51 }
 0x1a3   : > { %v840_v41 = vadd.f32 %v839_v37, %v825_v29  ;;  %v830_v7 = vmul.f32 %v812_v55, %v812_v55  ;;  %v814_v59 = vsub.f32 %v680_v62, %v798_v53 }
 0x1a4   : > { %v831_v9 = vmul.f32 %v813_v57, %v813_v57  ;;  %v815_v60 = vsub.f32 %v681_v2, %v799_v1 }
 0x1a5   : > { %v841_v52 = vadd.f32 %v840_v41, %v826_v39  ;;  %v832_v12 = vmul.f32 %v814_v59, %v814_v59 }
 0x1a6   : > { %v833_v16 = vmul.f32 %v815_v60, %v815_v60 }
 0x1a7   : > { %v842_v14 = vadd.f32 %v841_v52, %v827_v44 }
 0x1a9   : > { %v843_v23 = vadd.f32 %v842_v14, %v828_v54 }
 0x1ab   : > { %v844_v8 = vadd.f32 %v843_v23, %v829_v49 }
 0x1ad   : > { %v845_v10 = vadd.f32 %v844_v8, %v830_v7 }
 0x1af   : > { %v846_v13 = vadd.f32 %v845_v10, %v831_v9 }
 0x1b1   : > { %v847_v42 = vadd.f32 %v846_v13, %v832_v12 }
 0x1b3   : > { %v848_v58 = vadd.f32 %v847_v42, %v833_v16 }
 0x1b5   : > { %849 = vadd.xlane.f32.xlu0 %v848_v58 }
 0x242   : > { %v850_v25 = vpop.xlane.xlu0 %849 }
 0x243   : > { %v851_v18 = vrot.slane %v850_v25, 4 }
 0x245   : > { %v852_v31 = vadd.f32 %v851_v18, %v850_v25 }
 0x247   : > { %v853_v40 = vrot.slane %v852_v31, 2 }
 0x249   : > { %v854_v3 = vadd.f32 %v853_v40, %v852_v31 }
 0x24b   : > { %v855_v19 = vrot.slane %v854_v3, 1 }
 0x24d   : > { %v856_v30 = vadd.f32 %v855_v19, %v854_v3 }
 0x24f   : > { %1148 = vpush %v856_v30 }
 0x280   : > { %s1149_s27 = spop %1148 }
 0x281   : > { %s858_s28 = smul.f32 %s1149_s27, %s817_s11 }
 0x283   : > { %v859_v17 = vstv %s858_s28 }
 0x284   : > { %v860_v63 = vadd.f32 %v859_v17, %v816_v20 }
 0x286   : > { %861 = vst [vmem:[%s1642_s25] sm:$0xff] %v860_v63 }
 0x287 PF: > { %s1008_s30 = sshll.u32 %s1416_s19, 7  ;;  %s876_s29 = sshll.u32 %s1642_s25, 4  ;;  %s877_s29 = int_to_ptr.vmem [resolvable:$true] %s876_s29 }
 0x288   : > { %s1991_s26 = scalar_lea.hbm %s2050_s7, %s1008_s30  ;;  %s2090_s22 = sand.u32 1, %s1396_s2  }
 0x289   : > { %s863_s4 = scalar_lea.sflag [#allocation8], %s2090_s22  ;;  %s1316_s20 = scalar_lea.vmem %s877_s29, 128 }
 0x28a   : > { %p1317_p10 = scmp.ne.s32.totalorder %s877_s29, %s1316_s20  ;;  %p2091_p13 = scmp.ne.s32.totalorder %s2063_s0, 0 }
 0x28b   : > { %s1435_s12 = smov [#allocation9]  }
 0x28c   : > { %p1318_p8 = pnand %p1317_p10, %p2091_p13  ;;  %s1320_s13 = sshll.u32 %s1435_s12, 4  ;;  %s1321_s13 = int_to_ptr.vmem [resolvable:$false] %s1320_s13 }
 0x28d   : > { %s1322_s8 = scalar_lea.vmem %s1321_s13, 256  ;;  %p1323_p12 = scmp.lt.s32.totalorder %s877_s29, %s1321_s13 }
 0x28e   : > { %p1319_p4 = pneg %p1318_p8  ;;  %p1324_p0 = scmp.lt.s32.totalorder %s1322_s8, %s1316_s20 }
 0x290   : > { %p1325_p3 = por %p1324_p0, %p1323_p12 }
 0x292   : > { %p1326_p6 = pnand %p1325_p3, %p1319_p4 }
 0x294   : > { %1329 = shalt.err (!%p1326_p6)
}
 0x295   : > { %s1330_s19 = scalar_lea.hbm %s1991_s26, 128  ;;  %s1334_s24 = scalar_lea.hbm %s2050_s7, 256 }
 0x296   : > { %p1331_p7 = scmp.ne.s32.totalorder %s1991_s26, %s1330_s19  ;;  %p1335_p2 = scmp.lt.u32.totalorder %s1991_s26, %s2050_s7 }
 0x297   : > { %p1336_p5 = scmp.lt.u32.totalorder %s1334_s24, %s1330_s19  ;;  %p1338_p10 = scmp.lt.u32.totalorder %s1330_s19, %s1991_s26 }
 0x298   : > { %p1332_p11 = pnand %p1331_p7, %p2091_p13 }
 0x299   : > { %p1337_p9 = por %p1336_p5, %p1335_p2 }
 0x29a   : > { %p1333_p1 = pneg %p1332_p11 }
 0x29b   : > { %p1339_p8 = por %p1338_p10, %p1337_p9 }
 0x29d   : > { %p1340_p4 = pnand %p1339_p8, %p1333_p1 }
 0x29f   : > { %1343 = shalt.err (!%p1340_p4)
}
 0x2a0   : > { %1154 = dma.vmem_to_hbm [thread:$0]  (%p2091_p13), %s877_s29, 128, %s1991_s26, %s863_s4  }
 0x2a1 PF: > { %s888_s28 = sand.u32 1, %s1392_s14   ;;  %p2092_p12 = scmp.ne.s32.totalorder %s2064_s10, 0 }
 0x2a2   : > { %p2093_p0 = scmp.ge.s32.totalorder %s1424_s21, 2  ;;  %s889_s30 = scalar_lea.sflag [#allocation8], %s888_s28 }
 0x2a4   : > { %p1163_p3 = pnand %p2093_p0, %p2092_p12 }
 0x2a6   : > { %1387 = dma.done.wait (!%p1163_p3), %s889_s30, 128  }
 0x2a7   : > { %1389 = vsyncadd (!%p1163_p3), %s889_s30, 4294967168  ;;  %s37_s21 = sadd.s32 1, %s1424_s21   ;;  %s2094_s0 = sld [smem:[#allocation17_spill]] }
 0x2a8   : > { %p34_p6 = scmp.ge.s32.totalorder %s37_s21, 4   ;;  %s2095_s19 = sld [smem:[#allocation15_spill]] }
 0x2a9   : > { %s2096_s20 = sld [smem:[#allocation16_spill]]  ;;  %s2097_s14 = smov %s1396_s2 }
 0x2aa   : > { %s2098_s2 = smov %s1400_s15  ;;  %s2099_s15 = smov %s1554_s9 }
 0x2ab   : > { %s2100_s16 = smov %s1408_s17  ;;  %s2101_s17 = smov %s1412_s18 }
 0x2ac   :  { %36 = sbr.rel (!%p34_p6) target bundleno = 44 (0x2c), region = 98 }
 0x2ad   : > { %s2102_s18 = smov %s2094_s0 }
 0x2b3   :  { %894 = vsyncpa [#allocation7], 1 }
 0x2b4   :  { %896 = vsyncpa [#allocation7 + $0x1], 1 }
 0x2b5   :  { %897 = vsyncpa [#allocation8], 1 }
 0x2b6   :  { %899 = vsyncpa [#allocation8 + $0x1], 1 }

</bundles_post_ra>
